<compile_context>
chip_gen: v5e
topology: v5e:2x2
jax: 0.10.0
libtpu: 0.0.40
codegen_flags: <defaults>
</compile_context>

<pallas_src>
import functools

import jax
import jax.numpy as jnp
from jax.experimental import pallas as pl
from jax.experimental.pallas import tpu as pltpu


def _round_up(n: int, m: int) -> int:
    return ((n + m - 1) // m) * m


def _physical_vmem_bytes() -> int:
    # Best-effort hardware query; fall back to the v7x floor (64 MiB) so the
    # budget stays safe on every generation.
    try:
        return int(pltpu.get_tpu_info().vmem_capacity_bytes)
    except Exception:
        return 64 << 20


_PHYS_VMEM = _physical_vmem_bytes()


def mlp_kernel(x_ref, w1_ref, b1_ref, w2_ref, b2_ref, o_ref, acc_ref):
    """out = relu(x @ w1 + b1) @ w2 + b2, accumulated over hidden tiles."""
    ht = pl.program_id(1)

    @pl.when(ht == 0)
    def _init():
        acc_ref[...] = jnp.zeros_like(acc_ref)

    # First matmul (MXU, f32 accumulation) + bias + ReLU epilogue (VPU, f32).
    h = jnp.dot(x_ref[...], w1_ref[...], preferred_element_type=jnp.float32)
    h = jnp.maximum(h + b1_ref[...], 0.0)          # b1_ref is (1, TH) -> broadcasts
    # Second matmul: accumulate this hidden tile's contribution.
    acc_ref[...] += jnp.dot(h.astype(w2_ref.dtype), w2_ref[...],
                            preferred_element_type=jnp.float32)

    @pl.when(ht == pl.num_programs(1) - 1)
    def _finalize():
        o_ref[...] = (acc_ref[...] + b2_ref[...]).astype(o_ref.dtype)


def prepare_params(w1, b1, w2, b2, *, compute_dtype=jnp.float32):
    """One-time parameter prep (do NOT call per forward pass).

    w1: [n_feature, n_hidden]   b1: [n_hidden]
    w2: [n_hidden, n_output]    b2: [n_output]
    (PyTorch nn.Linear weights pre-transposed to [in, out].)

    Pads the hidden dim up to a multiple of 128 lanes (zero rows/cols are
    numerically inert) and casts weights to the MXU compute dtype (use
    jnp.bfloat16 on v6e/v7x for ~3x MXU throughput and half the weight
    footprint).  Biases stay float32; the bias/ReLU epilogue runs in f32.
    """
    F, H = w1.shape
    O = w2.shape[1]
    HP = _round_up(H, 128)
    w1p = jnp.zeros((F, HP), compute_dtype).at[:, :H].set(w1.astype(compute_dtype))
    b1p = jnp.zeros((1, HP), jnp.float32).at[0, :H].set(b1.astype(jnp.float32))
    w2p = jnp.zeros((HP, O), compute_dtype).at[:H, :].set(w2.astype(compute_dtype))
    b2p = b2.astype(jnp.float32).reshape(1, O)
    return w1p, b1p, w2p, b2p


def _auto_hidden_tile(F, HP, O, itemsize, phys_vmem):
    """Largest 128-multiple hidden tile that divides HP and fits the VMEM budget."""
    F8 = _round_up(F, 8)
    Ol = _round_up(O, 128)
    budget = max(phys_vmem // 2, 8 << 20)
    th = HP
    while th > 128:
        nbuf = 1 if th == HP else 2
        need = nbuf * (F8 * th + th * Ol + 8 * th) * itemsize
        if HP % th == 0 and need <= budget:
            return th
        th -= 128
    return 128


@functools.partial(jax.jit, static_argnames=("batch_tile", "hidden_tile"))
def net_forward(x, params, *, batch_tile=512, hidden_tile=None):
    """Fused Linear -> ReLU -> Linear.  x: [B, n_feature] -> [B, n_output]."""
    w1p, b1p, w2p, b2p = params
    B, F = x.shape
    HP = w1p.shape[1]
    O = w2p.shape[1]
    out_dtype = x.dtype
    mxu_dtype = w1p.dtype
    itemsize = jnp.dtype(mxu_dtype).itemsize
    out_isz = jnp.dtype(out_dtype).itemsize

    xc = x.astype(mxu_dtype)   # no-op for f32; fuses under jit for bf16

    # Batch tile (sublane-aligned).  Default batch_tile=512 is a multiple of 16
    # so bf16-packed sublanes stay full for large batches.
    TB = min(batch_tile, _round_up(B, 8))
    nb = pl.cdiv(B, TB)        # last partial batch tile's rows are masked on write

    # Hidden tiling: single grid step (weights fully VMEM-resident) when they
    # fit, otherwise stream (F, TH)/(TH, O) slices and accumulate.
    if hidden_tile is None:
        TH = _auto_hidden_tile(F, HP, O, itemsize, _PHYS_VMEM)
    else:
        TH = _round_up(min(hidden_tile, HP), 128)
        while HP % TH != 0:
            TH -= 128
    nh = HP // TH

    if nh == 1:
        # Whole arrays placed in VMEM once: single-buffered, never re-DMA'd.
        resident = pl.BlockSpec(memory_space=pltpu.MemorySpace.VMEM)
        w1_spec, b1_spec, w2_spec = resident, resident, resident
    else:
        w1_spec = pl.BlockSpec((F, TH), lambda i, h: (0, h))
        b1_spec = pl.BlockSpec((1, TH), lambda i, h: (0, h))
        w2_spec = pl.BlockSpec((TH, O), lambda i, h: (h, 0))
    b2_spec = pl.BlockSpec((1, O), lambda i, h: (0, 0))

    # Explicit VMEM budget: v5e/v6e scoped defaults are 16/32 MiB, v7x physical
    # VMEM is only 64 MiB.
    F8, Fl, Ol = _round_up(F, 8), _round_up(F, 128), _round_up(O, 128)
    w_bufs = 1 if nh == 1 else 2
    need = (2 * TB * Fl * itemsize                       # double-buffered x tiles
            + 2 * TB * Ol * out_isz                      # double-buffered out tiles
            + TB * Ol * 4                                # f32 accumulator scratch
            + w_bufs * (F8 * TH + TH * Ol) * itemsize    # weight slices
            + w_bufs * 8 * TH * 4 + 8 * Ol * 4)          # biases
    vmem_limit = int(min(_PHYS_VMEM - (2 << 20),
                         max(32 << 20, int(need * 1.5) + (4 << 20))))

    w_bytes = (w1p.size + w2p.size) * itemsize
    cost = pl.CostEstimate(
        flops=2 * B * (F * HP + HP * O),
        transcendentals=0,
        bytes_accessed=int(xc.size * itemsize
                           + (w_bytes if nh == 1 else w_bytes * nb)
                           + (b1p.size + b2p.size) * 4
                           + B * O * out_isz),
    )

    # TODO(synk): for small-batch inference on v7x (grid of 1-2 batch tiles),
    # add a second "parallel" output-column axis so both TensorCores get work.
    return pl.pallas_call(
        mlp_kernel,
        out_shape=jax.ShapeDtypeStruct((B, O), out_dtype),
        grid_spec=pltpu.PrefetchScalarGridSpec(
            num_scalar_prefetch=0,
            grid=(nb, nh),
            in_specs=[
                # x: tiled over the batch axis, reused across hidden tiles.
                pl.BlockSpec((TB, F), lambda i, h: (i, 0)),
                w1_spec, b1_spec, w2_spec, b2_spec,
            ],
            out_specs=pl.BlockSpec((TB, O), lambda i, h: (i, 0)),
            scratch_shapes=[pltpu.VMEM((TB, O), jnp.float32)],
        ),
        compiler_params=pltpu.CompilerParams(
            # Batch tiles are independent (megacore-shardable); hidden axis is a
            # reduction for the second matmul -> "arbitrary".
            dimension_semantics=("parallel", "arbitrary"),
            vmem_limit_bytes=vmem_limit,
        ),
        cost_estimate=cost,
    )(xc, w1p, b1p, w2p, b2p)


if __name__ == "__main__":
    # Small shapes consistent with Net(n_feature, n_hidden, n_output)
    batch = 8
    n_feature = 32
    n_hidden = 64
    n_output = 8

    key = jax.random.PRNGKey(0)
    kx, kw1, kb1, kw2, kb2, kw3, kb3, kw4, kb4 = jax.random.split(key, 9)

    x = jax.random.normal(kx, (batch, n_feature), dtype=jnp.float32)

    # Deterministic PyTorch-style uniform init: U(-1/sqrt(fan_in), 1/sqrt(fan_in)).
    lim1 = 1.0 / jnp.sqrt(jnp.float32(n_feature))
    lim2 = 1.0 / jnp.sqrt(jnp.float32(n_hidden))
    w1 = jax.random.uniform(kw1, (n_feature, n_hidden), jnp.float32, -lim1, lim1)
    b1 = jax.random.uniform(kb1, (n_hidden,), jnp.float32, -lim1, lim1)
    w2 = jax.random.uniform(kw2, (n_hidden, n_output), jnp.float32, -lim2, lim2)
    b2 = jax.random.uniform(kb2, (n_output,), jnp.float32, -lim2, lim2)

    ref = jnp.maximum(x @ w1 + b1, 0.0) @ w2 + b2

    # 1) f32 path, fully VMEM-resident (single-buffered) weights.
    params = prepare_params(w1, b1, w2, b2)
    out = net_forward(x, params)
    jax.block_until_ready(out)
    assert out.shape == (batch, n_output)
    assert jnp.allclose(out, ref, atol=1e-5, rtol=1e-5)

    # 2) bf16 MXU inputs (f32 accumulation + f32 bias/ReLU epilogue) — looser tol.
    params_bf16 = prepare_params(w1, b1, w2, b2, compute_dtype=jnp.bfloat16)
    out_bf16 = net_forward(x, params_bf16)
    jax.block_until_ready(out_bf16)
    assert jnp.allclose(out_bf16, ref, atol=3e-2, rtol=3e-2)

    # 3) Hidden-tiled streaming/accumulator path (what large F/H falls back to
    #    on v7x's 64 MiB VMEM): H=200 pads to 256 -> two 128-wide hidden tiles.
    n_hidden_big = 200
    lim3 = 1.0 / jnp.sqrt(jnp.float32(n_hidden_big))
    w1b = jax.random.uniform(kw3, (n_feature, n_hidden_big), jnp.float32, -lim1, lim1)
    b1b = jax.random.uniform(kb3, (n_hidden_big,), jnp.float32, -lim1, lim1)
    w2b = jax.random.uniform(kw4, (n_hidden_big, n_output), jnp.float32, -lim3, lim3)
    b2b = jax.random.uniform(kb4, (n_output,), jnp.float32, -lim3, lim3)
    params_big = prepare_params(w1b, b1b, w2b, b2b)
    out_big = net_forward(x, params_big, hidden_tile=128)
    jax.block_until_ready(out_big)
    ref_big = jnp.maximum(x @ w1b + b1b, 0.0) @ w2b + b2b
    assert out_big.shape == (batch, n_output)
    assert jnp.allclose(out_big, ref_big, atol=1e-4, rtol=1e-4)

    print("KERNEL_OK")
</pallas_src>

<mosaic_0001>
module attributes {stable_mosaic.version = 11 : i64} {
  func.func @mlp_kernel(%arg0: i32, %arg1: i32, %arg2: memref<8x32xf32, #tpu.memory_space<vmem>>, %arg3: memref<32x128xf32, #tpu.memory_space<vmem>>, %arg4: memref<1x128xf32, #tpu.memory_space<vmem>>, %arg5: memref<128x8xf32, #tpu.memory_space<vmem>>, %arg6: memref<1x8xf32, #tpu.memory_space<vmem>>, %arg7: memref<8x8xf32, #tpu.memory_space<vmem>>, %arg8: memref<8x8xf32, #tpu.memory_space<vmem>>) attributes {dimension_semantics = [#tpu.dimension_semantics<parallel>, #tpu.dimension_semantics<arbitrary>], iteration_bounds = array<i64: 1, 1>, scalar_prefetch = 0 : i64, scratch_operands = 1 : i64, tpu.core_type = #tpu.core_type<tc>, window_params = [{transform_indices = @transform_0, window_bounds = array<i64: 8, 32>}, {pipeline_mode = #tpu.pipeline_mode<synchronous>, transform_indices = @transform_1, window_bounds = array<i64: 32, 128>}, {pipeline_mode = #tpu.pipeline_mode<synchronous>, transform_indices = @transform_2, window_bounds = array<i64: 1, 128>}, {pipeline_mode = #tpu.pipeline_mode<synchronous>, transform_indices = @transform_3, window_bounds = array<i64: 128, 8>}, {pipeline_mode = #tpu.pipeline_mode<synchronous>, transform_indices = @transform_4, window_bounds = array<i64: 1, 8>}, {transform_indices = @transform_5, window_bounds = array<i64: 8, 8>}]} {
    %c0_i32 = arith.constant 0 : i32
    %0 = arith.cmpi eq, %arg1, %c0_i32 : i32
    %1 = arith.extui %0 : i1 to i32
    %c0_i32_0 = arith.constant 0 : i32
    %2 = arith.cmpi ne, %1, %c0_i32_0 : i32
    scf.if %2 {
      %cst_16 = arith.constant 0.000000e+00 : f32
      %19 = vector.broadcast %cst_16 : f32 to vector<8x8xf32>
      %c0_17 = arith.constant 0 : index
      %c0_18 = arith.constant 0 : index
      %20 = vector.load %arg8[%c0_17, %c0_18] : memref<8x8xf32, #tpu.memory_space<vmem>>, vector<8x8xf32>
      tpu.vector_store %arg8[%c0_17, %c0_18], %19 {strides = array<i32>} : memref<8x8xf32, #tpu.memory_space<vmem>>, vector<8x8xf32>,
    } else {
    }
    %c0 = arith.constant 0 : index
    %c0_1 = arith.constant 0 : index
    %3 = vector.load %arg2[%c0, %c0_1] : memref<8x32xf32, #tpu.memory_space<vmem>>, vector<8x32xf32>
    %c0_2 = arith.constant 0 : index
    %c0_3 = arith.constant 0 : index
    %4 = vector.load %arg3[%c0_2, %c0_3] : memref<32x128xf32, #tpu.memory_space<vmem>>, vector<32x128xf32>
    %cst = arith.constant dense<0.000000e+00> : vector<8x128xf32>
    %5 = tpu.matmul %3, %4, %cst {dimension_numbers = #tpu.dot_dimension_numbers<[1], [0], [0], [1], [0, 0, 1, 1], [], []>} : vector<8x32xf32>, vector<32x128xf32>, vector<8x128xf32> -> vector<8x128xf32>
    %c0_4 = arith.constant 0 : index
    %c0_5 = arith.constant 0 : index
    %6 = vector.load %arg4[%c0_4, %c0_5] : memref<1x128xf32, #tpu.memory_space<vmem>>, vector<1x128xf32>
    %7 = vector.broadcast %6 : vector<1x128xf32> to vector<8x128xf32>
    %8 = arith.addf %5, %7 : vector<8x128xf32>
    %cst_6 = arith.constant 0.000000e+00 : f32
    %9 = vector.broadcast %cst_6 : f32 to vector<8x128xf32>
    %10 = arith.maximumf %8, %9 : vector<8x128xf32>
    %c0_7 = arith.constant 0 : index
    %c0_8 = arith.constant 0 : index
    %11 = vector.load %arg8[%c0_7, %c0_8] : memref<8x8xf32, #tpu.memory_space<vmem>>, vector<8x8xf32>
    %c0_9 = arith.constant 0 : index
    %c0_10 = arith.constant 0 : index
    %12 = vector.load %arg5[%c0_9, %c0_10] : memref<128x8xf32, #tpu.memory_space<vmem>>, vector<128x8xf32>
    %cst_11 = arith.constant dense<0.000000e+00> : vector<8x8xf32>
    %13 = tpu.matmul %10, %12, %cst_11 {dimension_numbers = #tpu.dot_dimension_numbers<[1], [0], [0], [1], [0, 0, 1, 1], [], []>} : vector<8x128xf32>, vector<128x8xf32>, vector<8x8xf32> -> vector<8x8xf32>
    %14 = arith.addf %11, %13 : vector<8x8xf32>
    %c0_12 = arith.constant 0 : index
    %c0_13 = arith.constant 0 : index
    %15 = vector.load %arg8[%c0_12, %c0_13] : memref<8x8xf32, #tpu.memory_space<vmem>>, vector<8x8xf32>
    tpu.vector_store %arg8[%c0_12, %c0_13], %14 {strides = array<i32>} : memref<8x8xf32, #tpu.memory_space<vmem>>, vector<8x8xf32>,
    %c0_i32_14 = arith.constant 0 : i32
    %16 = arith.cmpi eq, %arg1, %c0_i32_14 : i32
    %17 = arith.extui %16 : i1 to i32
    %c0_i32_15 = arith.constant 0 : i32
    %18 = arith.cmpi ne, %17, %c0_i32_15 : i32
    scf.if %18 {
      %c0_16 = arith.constant 0 : index
      %c0_17 = arith.constant 0 : index
      %19 = vector.load %arg8[%c0_16, %c0_17] : memref<8x8xf32, #tpu.memory_space<vmem>>, vector<8x8xf32>
      %c0_18 = arith.constant 0 : index
      %c0_19 = arith.constant 0 : index
      %20 = vector.load %arg6[%c0_18, %c0_19] : memref<1x8xf32, #tpu.memory_space<vmem>>, vector<1x8xf32>
      %21 = vector.broadcast %20 : vector<1x8xf32> to vector<8x8xf32>
      %22 = arith.addf %19, %21 : vector<8x8xf32>
      %c0_20 = arith.constant 0 : index
      %c0_21 = arith.constant 0 : index
      %23 = vector.load %arg7[%c0_20, %c0_21] : memref<8x8xf32, #tpu.memory_space<vmem>>, vector<8x8xf32>
      tpu.vector_store %arg7[%c0_20, %c0_21], %22 {strides = array<i32>} : memref<8x8xf32, #tpu.memory_space<vmem>>, vector<8x8xf32>,
    } else {
    }
    return
  }
  func.func @transform_0(%arg0: i32, %arg1: i32) -> (i32, i32) {
    %c0_i32 = arith.constant 0 : i32
    %c0_i32_0 = arith.constant 0 : i32
    return %arg0, %c0_i32 : i32, i32
  }
  func.func @transform_1(%arg0: i32, %arg1: i32) -> (i32, i32) {
    %c0_i32 = arith.constant 0 : i32
    %c0_i32_0 = arith.constant 0 : i32
    %c0_i32_1 = arith.constant 0 : i32
    return %c0_i32, %c0_i32_0 : i32, i32
  }
  func.func @transform_2(%arg0: i32, %arg1: i32) -> (i32, i32) {
    %c0_i32 = arith.constant 0 : i32
    %c0_i32_0 = arith.constant 0 : i32
    %c0_i32_1 = arith.constant 0 : i32
    return %c0_i32, %c0_i32_0 : i32, i32
  }
  func.func @transform_3(%arg0: i32, %arg1: i32) -> (i32, i32) {
    %c0_i32 = arith.constant 0 : i32
    %c0_i32_0 = arith.constant 0 : i32
    %c0_i32_1 = arith.constant 0 : i32
    return %c0_i32, %c0_i32_0 : i32, i32
  }
  func.func @transform_4(%arg0: i32, %arg1: i32) -> (i32, i32) {
    %c0_i32 = arith.constant 0 : i32
    %c0_i32_0 = arith.constant 0 : i32
    %c0_i32_1 = arith.constant 0 : i32
    return %c0_i32, %c0_i32_0 : i32, i32
  }
  func.func @transform_5(%arg0: i32, %arg1: i32) -> (i32, i32) {
    %c0_i32 = arith.constant 0 : i32
    %c0_i32_0 = arith.constant 0 : i32
    return %arg0, %c0_i32 : i32, i32
  }
}

</mosaic_0001>

<bundles_post_ra>
// kernel: net_forward.1
= control target key start
LH: loop header
LB: loop body
LE: loop exit
PB: predicated region body
PF: predicated region fallthrough
CT: control target
= control target key end

     0   :  { %vm36_vm0 = vcmask 261120   ;;  %s265_s0 = inlined_call_operand.vmem [shape: f32[8,32], index: 0, kind: input, shape index: {}]   ;;  %s266_s1 = inlined_call_operand.vmem [shape: f32[32,128], index: 1, kind: input, shape index: {}]   ;;  %s267_s2 = inlined_call_operand.vmem [shape: f32[1,128], index: 2, kind: input, shape index: {}]   ;;  %s268_s3 = inlined_call_operand.vmem [shape: f32[128,8], index: 3, kind: input, shape index: {}]   ;;  %s269_s4 = inlined_call_operand.vmem [shape: f32[1,8], index: 4, kind: input, shape index: {}]   ;;  %s270_s5 = inlined_call_operand.hbm [shape: f32[8,8], index: 5, kind: output, shape index: {}]  }
   0x1   :  { %v31_v0 = vld [vmem:[%s266_s1 + $0x18] sm:$0xff]  ;;  %v30_v1 = vld [vmem:[%s266_s1 + $0x10] sm:$0xff]  ;;  %v29_v3 = vld [vmem:[%s266_s1 + $0x8] sm:$0xff] }
   0x2   :  { %52 = vmatpush.msra.mxu0 %v31_v0  ;;  %v77_v2 = vld [vmem:[%s268_s3 + $0x78] sm:$0xff]  ;;  %v76_v4 = vld [vmem:[%s268_s3 + $0x70] sm:$0xff]  ;;  %v75_v5 = vld [vmem:[%s268_s3 + $0x68] sm:$0xff] }
   0x3   :  { %78 = vmatpush.msra.mxu1 %v77_v2  ;;  %v28_v6 = vld [vmem:[%s266_s1] sm:$0xff] }
   0x4   :  { %53 = vmatpush.msra.mxu0 %v30_v1  ;;  %v27_v7 = vld [vmem:[%s265_s0] sm:$0xff] }
   0x5   :  { %79 = vmatpush.msra.mxu1 %v76_v4  ;;  %v74_v8 = vld [vmem:[%s268_s3 + $0x60] sm:$0xff] }
   0x6   :  { %54 = vmatpush.msra.mxu0 %v29_v3 }
   0x7   :  { %80 = vmatpush.msra.mxu1 %v75_v5 }
   0x8   :  { %10 = vsyncpa [#allocation4], 0  ;;  %55 = vmatpush.msra.mxu0 %v28_v6  ;;  %v73_v9 = vld [vmem:[%s268_s3 + $0x58] sm:$0xff]  ;;  %v72_v10 = vld [vmem:[%s268_s3 + $0x50] sm:$0xff]  ;;  %vm25_vm1 = vcmask 64512   ;;  %v158_v21 = vmov 0.0  }
   0x9   :  { %127 = vmatmul.msk.f32.vlgmr.msra.gmra.mxu0 %vm36_vm0, %v27_v7  ;;  %81 = vmatpush.msra.mxu1 %v74_v8  ;;  %v71_v11 = vld [vmem:[%s268_s3 + $0x48] sm:$0xff]  ;;  %v70_v12 = vld [vmem:[%s268_s3 + $0x40] sm:$0xff]  ;;  %v69_v13 = vld [vmem:[%s268_s3 + $0x38] sm:$0xff]  ;;  %26 = vst.msk [vmem:[#allocation2] sm:$0xff] %vm25_vm1, %v158_v21  ;;  %s159_s11 = smov [#allocation3]   ;;  %s118_s0 = sshll.u32 %s270_s5, 4  ;;  %s119_s0 = int_to_ptr.hbm [resolvable:$true] %s118_s0 }
   0xa   :  { %v68_v14 = vld [vmem:[%s268_s3 + $0x30] sm:$0xff]  ;;  %v67_v15 = vld [vmem:[%s268_s3 + $0x28] sm:$0xff]  ;;  %v66_v16 = vld [vmem:[%s268_s3 + $0x20] sm:$0xff]  ;;  %s116_s12 = sshll.u32 %s159_s11, 4  ;;  %s117_s12 = int_to_ptr.vmem [resolvable:$true] %s116_s12 }
   0xb   :  { %82 = vmatpush.msra.mxu1 %v73_v9  ;;  %v65_v17 = vld [vmem:[%s268_s3 + $0x18] sm:$0xff]  ;;  %v64_v18 = vld [vmem:[%s268_s3 + $0x10] sm:$0xff]  ;;  %v63_v19 = vld [vmem:[%s268_s3 + $0x8] sm:$0xff] }
   0xc   :  { %v62_v20 = vld [vmem:[%s268_s3] sm:$0xff] }
   0xd   :  { %83 = vmatpush.msra.mxu1 %v72_v10  ;;  %v130_v22 = vld [vmem:[%s267_s2] ss:$0 sm:$0xff] }
   0xe   :  { %v131_v29 = vld [vmem:[%s269_s4] ss:$0 sm:$0xff] }
   0xf   :  { %84 = vmatpush.msra.mxu1 %v71_v11 }
  0x10   :  { %v61_v26 = vld [vmem:[#allocation2] sm:$0xff] }
  0x11   :  { %85 = vmatpush.msra.mxu1 %v70_v12 }
  0x13   :  { %86 = vmatpush.msra.mxu1 %v69_v13 }
  0x15   :  { %87 = vmatpush.msra.mxu1 %v68_v14 }
  0x17   :  { %88 = vmatpush.msra.mxu1 %v67_v15 }
  0x19   :  { %89 = vmatpush.msra.mxu1 %v66_v16 }
  0x1b   :  { %90 = vmatpush.msra.mxu1 %v65_v17 }
  0x1d   :  { %91 = vmatpush.msra.mxu1 %v64_v18 }
  0x1f   :  { %92 = vmatpush.msra.mxu1 %v63_v19 }
  0x21   :  { %93 = vmatpush.msra.mxu1 %v62_v20 }
  0x86   :  { %v57_v23 = vpop.f32.mrf.mxu0 }
  0x87   :  { %v58_v24 = vadd.f32 %v130_v22, %v57_v23 }
  0x89   :  { %v60_v25 = vmax.f32 %v58_v24, 0.0 }
  0x8b   :  { %94 = vmatmul.f32.vlgmr.msra.gmra.mxu1 %v60_v25 }
 0x108   :  { %v95_v27 = vpop.f32.mrf.mxu1 }
 0x109   :  { %v98_v28 = vadd.f32 %v95_v27, %v61_v26 }
 0x10b   :  { %100 = vst.msk [vmem:[#allocation2] sm:$0xff] %vm25_vm1, %v98_v28 }
 0x112   :  { %v104_v30 = vld [vmem:[#allocation2] sm:$0xff] }
 0x113   :  { %v109_v31 = vadd.f32 %v131_v29, %v104_v30 }
 0x115   :  { %110 = vst.msk [vmem:[#allocation3] sm:$0xff] %vm25_vm1, %v109_v31 }
 0x116   :  { %121 = dma.vmem_to_hbm [thread:$0]  %s117_s12, 128, %s119_s0, [#allocation4]  }
 0x117   :  { %156 = dma.done.wait [#allocation4], 128  }
 0x118   :  { %157 = vsyncadd [#allocation4], 4294967168 }
 0x119   :  { %126 = vsyncpa [#allocation4], 1 }

</bundles_post_ra>
